<compile_context>
chip_gen: v7x
topology: tpu7x:2x2x1
jax: 0.10.0
libtpu: 0.0.40
codegen_flags: <defaults>
</compile_context>

<pallas_src>
import functools

import jax
import jax.numpy as jnp
from jax.experimental import pallas as pl
from jax.experimental.pallas import tpu as pltpu


def _blockdiag_linear_kernel(x_ref, w_ref, b_ref, o_ref):
    # Hot path: one lane-dense MXU matmul + VPU bias add, full-width stores.
    acc = jnp.dot(x_ref[...], w_ref[...], preferred_element_type=jnp.float32)
    o_ref[...] = (acc + b_ref[...]).astype(o_ref.dtype)


@functools.partial(jax.jit, static_argnames=("row_tile",))
def phase_projection(phases: jax.Array, weight: jax.Array, bias: jax.Array,
                     *, row_tile: int = 1024) -> jax.Array:
    """Equivalent of PhaseProjectionModel.forward.

    phases: [batch, n_phases]
    weight: [n_phases_out, n_phases_in]   (PyTorch Linear layout)
    bias:   [n_phases_out]
    """
    batch, n_phases = phases.shape
    lane = 128

    # Feature padding / row folding geometry.
    if n_phases <= lane:
        p_pad = max(1, pl.next_power_of_2(n_phases))   # divides 128
        fold = lane // p_pad
    else:
        p_pad = pl.cdiv(n_phases, lane) * lane          # multiple of 128
        fold = 1
    width = fold * p_pad                                # lane-dense width

    # Folded-row geometry: pad batch so it reshapes cleanly into whole tiles.
    rows = pl.cdiv(batch, fold)
    tb = max(8, min(((row_tile + 7) // 8) * 8, ((rows + 7) // 8) * 8))
    rows_pad = pl.cdiv(rows, tb) * tb
    batch_pad = rows_pad * fold

    x = jnp.pad(phases, ((0, batch_pad - batch), (0, p_pad - n_phases)))
    x_folded = x.reshape(rows_pad, width)               # row-major fold onto lanes

    # Parameter prep (cheap glue outside the kernel).
    w_pad = jnp.pad(weight, ((0, p_pad - n_phases), (0, p_pad - n_phases)))
    b_pad = jnp.pad(bias, (0, p_pad - n_phases))
    w_block = jnp.kron(jnp.eye(fold, dtype=w_pad.dtype), w_pad.T)   # [width, width]
    b_tile = jnp.tile(b_pad, fold).reshape(1, width)                # [1, width]

    grid = (rows_pad // tb,)
    out_folded = pl.pallas_call(
        _blockdiag_linear_kernel,
        out_shape=jax.ShapeDtypeStruct((rows_pad, width), phases.dtype),
        grid_spec=pltpu.PrefetchScalarGridSpec(
            num_scalar_prefetch=0,
            grid=grid,
            in_specs=[
                pl.BlockSpec((tb, width), lambda i: (i, 0)),       # x tiles stream
                pl.BlockSpec((width, width), lambda i: (0, 0)),    # W_block resident
                pl.BlockSpec((1, width), lambda i: (0, 0)),        # bias resident
            ],
            out_specs=pl.BlockSpec((tb, width), lambda i: (i, 0)),
        ),
        compiler_params=pltpu.CompilerParams(
            dimension_semantics=("parallel",)),
    )(x_folded, w_block, b_tile)

    return out_folded.reshape(batch_pad, p_pad)[:batch, :n_phases]


if __name__ == "__main__":
    key = jax.random.PRNGKey(0)
    k_b, k_x, k_x2, k_b3, k_w3, k_x3 = jax.random.split(key, 6)

    # Deterministic parameter init mirroring the module's __init__:
    #  - weight <- identity (weight.data.copy_(torch.eye(n_phases)))
    #  - bias   <- uniform(-1/sqrt(n_phases), 1/sqrt(n_phases))  (Linear default)
    n_phases = 8
    weight = jnp.eye(n_phases, dtype=jnp.float32)
    bound = 1.0 / (n_phases ** 0.5)
    bias = jax.random.uniform(k_b, (n_phases,), minval=-bound, maxval=bound,
                              dtype=jnp.float32)

    # Small case matching the module's typical use (batch=8).
    batch = 8
    phases = jax.random.normal(k_x, (batch, n_phases), dtype=jnp.float32)
    out = phase_projection(phases, weight, bias)
    jax.block_until_ready(out)
    ref = phases @ weight.T + bias
    assert out.shape == (batch, n_phases)
    assert jnp.allclose(out, ref, atol=1e-5, rtol=1e-5)

    # Larger ragged case exercising row folding, padding, and a multi-step grid.
    batch2 = 2500
    phases2 = jax.random.normal(k_x2, (batch2, n_phases), dtype=jnp.float32)
    out2 = phase_projection(phases2, weight, bias, row_tile=64)
    jax.block_until_ready(out2)
    ref2 = phases2 @ weight.T + bias
    assert out2.shape == (batch2, n_phases)
    assert jnp.allclose(out2, ref2, atol=1e-5, rtol=1e-5)

    # Non-power-of-two n_phases with a trained (non-identity) weight:
    # exercises feature-dim padding of x / W / b.
    n_phases3 = 6
    weight3 = jnp.eye(n_phases3, dtype=jnp.float32) + 0.01 * jax.random.normal(
        k_w3, (n_phases3, n_phases3), dtype=jnp.float32)
    bias3 = jax.random.uniform(k_b3, (n_phases3,), minval=-1.0, maxval=1.0,
                               dtype=jnp.float32)
    batch3 = 300
    phases3 = jax.random.normal(k_x3, (batch3, n_phases3), dtype=jnp.float32)
    out3 = phase_projection(phases3, weight3, bias3)
    jax.block_until_ready(out3)
    ref3 = phases3 @ weight3.T + bias3
    assert out3.shape == (batch3, n_phases3)
    assert jnp.allclose(out3, ref3, atol=1e-5, rtol=1e-5)

    print("KERNEL_OK")
</pallas_src>

<mosaic_0001>
module attributes {stable_mosaic.version = 11 : i64} {
  func.func @_blockdiag_linear_kernel(%arg0: i32, %arg1: memref<8x128xf32, #tpu.memory_space<vmem>>, %arg2: memref<128x128xf32, #tpu.memory_space<vmem>>, %arg3: memref<1x128xf32, #tpu.memory_space<vmem>>, %arg4: memref<8x128xf32, #tpu.memory_space<vmem>>) attributes {dimension_semantics = [#tpu.dimension_semantics<parallel>], iteration_bounds = array<i64: 1>, scalar_prefetch = 0 : i64, scratch_operands = 0 : i64, tpu.core_type = #tpu.core_type<tc>, window_params = [{transform_indices = @transform_0, window_bounds = array<i64: 8, 128>}, {pipeline_mode = #tpu.pipeline_mode<synchronous>, transform_indices = @transform_1, window_bounds = array<i64: 128, 128>}, {pipeline_mode = #tpu.pipeline_mode<synchronous>, transform_indices = @transform_2, window_bounds = array<i64: 1, 128>}, {transform_indices = @transform_3, window_bounds = array<i64: 8, 128>}]} {
    %c0 = arith.constant 0 : index
    %c0_0 = arith.constant 0 : index
    %0 = vector.load %arg1[%c0, %c0_0] : memref<8x128xf32, #tpu.memory_space<vmem>>, vector<8x128xf32>
    %c0_1 = arith.constant 0 : index
    %c0_2 = arith.constant 0 : index
    %1 = vector.load %arg2[%c0_1, %c0_2] : memref<128x128xf32, #tpu.memory_space<vmem>>, vector<128x128xf32>
    %cst = arith.constant dense<0.000000e+00> : vector<8x128xf32>
    %2 = tpu.matmul %0, %1, %cst {dimension_numbers = #tpu.dot_dimension_numbers<[1], [0], [0], [1], [0, 0, 1, 1], [], []>} : vector<8x128xf32>, vector<128x128xf32>, vector<8x128xf32> -> vector<8x128xf32>
    %c0_3 = arith.constant 0 : index
    %c0_4 = arith.constant 0 : index
    %3 = vector.load %arg3[%c0_3, %c0_4] : memref<1x128xf32, #tpu.memory_space<vmem>>, vector<1x128xf32>
    %4 = vector.broadcast %3 : vector<1x128xf32> to vector<8x128xf32>
    %5 = arith.addf %2, %4 : vector<8x128xf32>
    %c0_5 = arith.constant 0 : index
    %c0_6 = arith.constant 0 : index
    %6 = vector.load %arg4[%c0_5, %c0_6] : memref<8x128xf32, #tpu.memory_space<vmem>>, vector<8x128xf32>
    tpu.vector_store %arg4[%c0_5, %c0_6], %5 {strides = array<i32>} : memref<8x128xf32, #tpu.memory_space<vmem>>, vector<8x128xf32>,
    return
  }
  func.func @transform_0(%arg0: i32) -> (i32, i32) {
    %c0_i32 = arith.constant 0 : i32
    %c0_i32_0 = arith.constant 0 : i32
    return %arg0, %c0_i32 : i32, i32
  }
  func.func @transform_1(%arg0: i32) -> (i32, i32) {
    %c0_i32 = arith.constant 0 : i32
    %c0_i32_0 = arith.constant 0 : i32
    %c0_i32_1 = arith.constant 0 : i32
    return %c0_i32, %c0_i32_0 : i32, i32
  }
  func.func @transform_2(%arg0: i32) -> (i32, i32) {
    %c0_i32 = arith.constant 0 : i32
    %c0_i32_0 = arith.constant 0 : i32
    %c0_i32_1 = arith.constant 0 : i32
    return %c0_i32, %c0_i32_0 : i32, i32
  }
  func.func @transform_3(%arg0: i32) -> (i32, i32) {
    %c0_i32 = arith.constant 0 : i32
    %c0_i32_0 = arith.constant 0 : i32
    return %arg0, %c0_i32 : i32, i32
  }
}

</mosaic_0001>

<bundles_post_ra>
// kernel: tile.8
= control target key start
LH: loop header
LB: loop body
LE: loop exit
PB: predicated region body
PF: predicated region fallthrough
CT: control target
= control target key end

     0   :  { %s28_s0 = inlined_call_operand.vmem [shape: f32[8], index: 0, kind: input, shape index: {}]   ;;  %s29_s1 = inlined_call_operand.vmem [shape: f32[16,8], index: 1, kind: output, shape index: {}]  }
   0x1   :  { %v4_v0 = vld [vmem:[%s28_s0] ss:$0 sm:$0xff] }
   0x2   :  { %5 = vst [vmem:[%s29_s1] sm:$0xff] %v4_v0  ;;  %8 = vst [vmem:[%s29_s1 + $0x8] sm:$0xff] %v4_v0 }

// kernel: tile.9
= control target key start
LH: loop header
LB: loop body
LE: loop exit
PB: predicated region body
PF: predicated region fallthrough
CT: control target
= control target key end

     0   :  { %s131_s10 = smov 120   ;;  %s132_s11 = smov 104   ;;  %vm3_vm0 = vcmask 64512   ;;  %vm9_vm1 = vcmask 1048512   ;;  %vm15_vm2 = vcmask 982912   ;;  %vm21_vm3 = vcmask 917312   ;;  %s207_s0 = inlined_call_operand.vmem [shape: f32[16,8], index: 0, kind: input, shape index: {}]   ;;  %s208_s1 = inlined_call_operand.vmem [shape: f32[1,128], index: 1, kind: output, shape index: {}]  }
   0x1   :  { %v101_v0 = vld [vmem:[%s207_s0 + $0xf] sm:$0x1]   ;;  %v103_v1 = vld [vmem:[%s207_s0 + $0xd] sm:$0x1]   ;;  %v102_v2 = vld [vmem:[%s207_s0 + $0xe] sm:$0x1]  }
   0x2   :  { %7 = vrot.lane.b32.xlu0 %v101_v0, %s131_s10  ;;  %19 = vrot.lane.b32.xlu1 %v103_v1, %s132_s11  ;;  %v104_v3 = vld [vmem:[%s207_s0 + $0xc] sm:$0x1]   ;;  %s133_s16 = smov 112   ;;  %s134_s17 = smov 96   ;;  %v105_v4 = vld [vmem:[%s207_s0 + $0xb] sm:$0x1]  }
   0x3   :  { %v106_v5 = vld [vmem:[%s207_s0 + $0xa] sm:$0x1]   ;;  %v2_v6 = vld [vmem:[%s207_s0] sm:$0x1]   ;;  %s135_s24 = smov 88   ;;  %s136_s25 = smov 80  }
   0x4   :  { %4 = vst.msk [vmem:[#allocation0] sm:$0x1] %vm3_vm0, %v2_v6   ;;  %v107_v7 = vld [vmem:[%s207_s0 + $0x9] sm:$0x1]   ;;  %v108_v8 = vld [vmem:[%s207_s0 + $0x8] sm:$0x1]  }
   0x5   :  { %s137_s30 = smov 72   ;;  %s138_s2 = smov 64   ;;  %v109_v9 = vld [vmem:[%s207_s0 + $0x7] sm:$0x1]   ;;  %v110_v10 = vld [vmem:[%s207_s0 + $0x6] sm:$0x1]  }
   0x6   :  { %13 = vrot.lane.b32.xlu0 %v102_v2, %s133_s16  ;;  %25 = vrot.lane.b32.xlu1 %v104_v3, %s134_s17  ;;  %s139_s7 = smov 56   ;;  %s140_s8 = smov 48   ;;  %v111_v11 = vld [vmem:[%s207_s0 + $0x5] sm:$0x1]   ;;  %v112_v12 = vld [vmem:[%s207_s0 + $0x4] sm:$0x1]  }
   0x7   :  { %s141_s13 = smov 40   ;;  %s142_s14 = smov 32   ;;  %v113_v13 = vld [vmem:[%s207_s0 + $0x3] sm:$0x1]   ;;  %v114_v14 = vld [vmem:[%s207_s0 + $0x2] sm:$0x1]  }
   0x8   :  { %s143_s19 = smov 24   ;;  %s144_s20 = smov 16   ;;  %v115_v15 = vld [vmem:[%s207_s0 + $0x1] sm:$0x1]   ;;  %vm27_vm4 = vcmask 851712   ;;  %vm33_vm5 = vcmask 786112  }
   0x9   :  { %s145_s0 = smov 8   ;;  %vm39_vm6 = vcmask 720512   ;;  %vm45_vm7 = vcmask 654912   ;;  %vm51_vm8 = vcmask 589312   ;;  %vm57_vm9 = vcmask 523712  }
   0xa   :  { %31 = vrot.lane.b32.xlu0 %v105_v4, %s135_s24  ;;  %37 = vrot.lane.b32.xlu1 %v106_v5, %s136_s25  ;;  %vm63_vm10 = vcmask 458112   ;;  %vm69_vm11 = vcmask 392512   ;;  %vm75_vm12 = vcmask 326912   ;;  %vm81_vm13 = vcmask 261312  }
   0xb   :  { %vm87_vm14 = vcmask 195712   ;;  %vm93_vm15 = vcmask 130112  }
   0xe   :  { %43 = vrot.lane.b32.xlu0 %v107_v7, %s137_s30  ;;  %49 = vrot.lane.b32.xlu1 %v108_v8, %s138_s2 }
  0x12   :  { %55 = vrot.lane.b32.xlu0 %v109_v9, %s139_s7  ;;  %61 = vrot.lane.b32.xlu1 %v110_v10, %s140_s8 }
  0x16   :  { %67 = vrot.lane.b32.xlu0 %v111_v11, %s141_s13  ;;  %73 = vrot.lane.b32.xlu1 %v112_v12, %s142_s14 }
  0x1a   :  { %79 = vrot.lane.b32.xlu0 %v113_v13, %s143_s19  ;;  %85 = vrot.lane.b32.xlu1 %v114_v14, %s144_s20 }
  0x1e   :  { %91 = vrot.lane.b32.xlu0 %v115_v15, %s145_s0 }
  0x74   :  { %v8_v16 = vpop.permute.xlu0 %7   ;;  %v20_v17 = vpop.permute.xlu1 %19  }
  0x75   :  { %10 = vst.msk [vmem:[#allocation0] sm:$0x1] %vm9_vm1, %v8_v16  }
  0x78   :  { %v14_v18 = vpop.permute.xlu0 %13   ;;  %v26_v19 = vpop.permute.xlu1 %25  }
  0x79   :  { %16 = vst.msk [vmem:[#allocation0] sm:$0x1] %vm15_vm2, %v14_v18  }
  0x7a   :  { %22 = vst.msk [vmem:[#allocation0] sm:$0x1] %vm21_vm3, %v20_v17  }
  0x7b   :  { %28 = vst.msk [vmem:[#allocation0] sm:$0x1] %vm27_vm4, %v26_v19  }
  0x7c   :  { %v32_v20 = vpop.permute.xlu0 %31   ;;  %v38_v21 = vpop.permute.xlu1 %37  }
  0x7d   :  { %34 = vst.msk [vmem:[#allocation0] sm:$0x1] %vm33_vm5, %v32_v20  }
  0x7e   :  { %40 = vst.msk [vmem:[#allocation0] sm:$0x1] %vm39_vm6, %v38_v21  }
  0x80   :  { %v44_v22 = vpop.permute.xlu0 %43   ;;  %v50_v23 = vpop.permute.xlu1 %49  }
  0x81   :  { %46 = vst.msk [vmem:[#allocation0] sm:$0x1] %vm45_vm7, %v44_v22  }
  0x82   :  { %52 = vst.msk [vmem:[#allocation0] sm:$0x1] %vm51_vm8, %v50_v23  }
  0x84   :  { %v56_v24 = vpop.permute.xlu0 %55   ;;  %v62_v25 = vpop.permute.xlu1 %61  }
  0x85   :  { %58 = vst.msk [vmem:[#allocation0] sm:$0x1] %vm57_vm9, %v56_v24  }
  0x86   :  { %64 = vst.msk [vmem:[#allocation0] sm:$0x1] %vm63_vm10, %v62_v25  }
  0x88   :  { %v68_v26 = vpop.permute.xlu0 %67   ;;  %v74_v27 = vpop.permute.xlu1 %73  }
  0x89   :  { %70 = vst.msk [vmem:[#allocation0] sm:$0x1] %vm69_vm11, %v68_v26  }
  0x8a   :  { %76 = vst.msk [vmem:[#allocation0] sm:$0x1] %vm75_vm12, %v74_v27  }
  0x8c   :  { %v80_v28 = vpop.permute.xlu0 %79   ;;  %v86_v29 = vpop.permute.xlu1 %85  }
  0x8d   :  { %82 = vst.msk [vmem:[#allocation0] sm:$0x1] %vm81_vm13, %v80_v28  }
  0x8e   :  { %88 = vst.msk [vmem:[#allocation0] sm:$0x1] %vm87_vm14, %v86_v29  }
  0x90   :  { %v92_v30 = vpop.permute.xlu0 %91  }
  0x91   :  { %94 = vst.msk [vmem:[#allocation0] sm:$0x1] %vm93_vm15, %v92_v30  }
  0x98   :  { %v98_v31 = vld [vmem:[#allocation0] sm:$0x1] }
  0x99   :  { %100 = vst [vmem:[%s208_s1] sm:$0x1] %v98_v31 }

// kernel: phase_projection.1
= control target key start
LH: loop header
LB: loop body
LE: loop exit
PB: predicated region body
PF: predicated region fallthrough
CT: control target
= control target key end

     0   :  { %v193_v0 = vmov 0.0|0.0   ;;  %vm194_vm0 = vmmov 0   ;;  %v195_v4 = vmov 0.0   ;;  %s273_s1 = inlined_call_operand.vmem [shape: f32[128,128], index: 1, kind: input, shape index: {}]   ;;  %s274_s0 = inlined_call_operand.vmem [shape: f32[8,128], index: 0, kind: input, shape index: {}]   ;;  %s275_s2 = inlined_call_operand.vmem [shape: f32[1,128], index: 2, kind: input, shape index: {}]   ;;  %s276_s3 = inlined_call_operand.vmem [shape: f32[8,128], index: 3, kind: output, shape index: {}]  }
   0x1   :  { %166 = vmatprep.subr.bf16.mxu0 %v193_v0  ;;  %v15_v1 = vld [vmem:[%s273_s1] sm:$0xff]  ;;  %v16_v2 = vld [vmem:[%s273_s1 + $0x8] sm:$0xff]  ;;  %v17_v3 = vld [vmem:[%s273_s1 + $0x10] sm:$0xff]  ;;  %163 = vmatprep.mubr.msk.f32.mxu0 %vm194_vm0, %v195_v4 }
   0x2   :  { %v167_v5 = vpack.c.bf16 %v16_v2, %v15_v1  ;;  %v18_v6 = vld [vmem:[%s273_s1 + $0x18] sm:$0xff]  ;;  %v19_v8 = vld [vmem:[%s273_s1 + $0x20] sm:$0xff]  ;;  %v20_v9 = vld [vmem:[%s273_s1 + $0x28] sm:$0xff] }
   0x3   :  { %v170_v7 = vpack.c.bf16 %v18_v6, %v17_v3  ;;  %v173_v10 = vpack.c.bf16 %v20_v9, %v19_v8  ;;  %v21_v11 = vld [vmem:[%s273_s1 + $0x30] sm:$0xff]  ;;  %v22_v12 = vld [vmem:[%s273_s1 + $0x38] sm:$0xff]  ;;  %v23_v14 = vld [vmem:[%s273_s1 + $0x40] sm:$0xff] }
   0x4   :  { %168 = vmatpush3.bf16.msra.mxu0 %v167_v5  ;;  %v176_v13 = vpack.c.bf16 %v22_v12, %v21_v11  ;;  %v24_v15 = vld [vmem:[%s273_s1 + $0x48] sm:$0xff]  ;;  %v25_v17 = vld [vmem:[%s273_s1 + $0x50] sm:$0xff]  ;;  %v26_v18 = vld [vmem:[%s273_s1 + $0x58] sm:$0xff] }
   0x5   :  { %169 = vmatprep.subr.bf16.mxu0 %v193_v0  ;;  %v179_v16 = vpack.c.bf16 %v24_v15, %v23_v14  ;;  %v182_v19 = vpack.c.bf16 %v26_v18, %v25_v17  ;;  %v27_v20 = vld [vmem:[%s273_s1 + $0x60] sm:$0xff]  ;;  %v28_v21 = vld [vmem:[%s273_s1 + $0x68] sm:$0xff]  ;;  %v29_v23 = vld [vmem:[%s273_s1 + $0x70] sm:$0xff] }
   0x6   :  { %v185_v22 = vpack.c.bf16 %v28_v21, %v27_v20  ;;  %v30_v24 = vld [vmem:[%s273_s1 + $0x78] sm:$0xff]  ;;  %v14_v26 = vld [vmem:[%s274_s0] sm:$0xff] }
   0x7   :  { %v188_v25 = vpack.c.bf16 %v30_v24, %v29_v23  ;;  %v113_v27 = vld [vmem:[%s275_s2] ss:$0 sm:$0xff] }
   0x8   :  { %171 = vmatpush3.bf16.msra.mxu0 %v170_v7 }
   0x9   :  { %172 = vmatprep.subr.bf16.mxu0 %v193_v0 }
   0xc   :  { %174 = vmatpush3.bf16.msra.mxu0 %v173_v10 }
   0xd   :  { %175 = vmatprep.subr.bf16.mxu0 %v193_v0 }
  0x10   :  { %177 = vmatpush3.bf16.msra.mxu0 %v176_v13 }
  0x11   :  { %178 = vmatprep.subr.bf16.mxu0 %v193_v0 }
  0x14   :  { %180 = vmatpush3.bf16.msra.mxu0 %v179_v16 }
  0x15   :  { %181 = vmatprep.subr.bf16.mxu0 %v193_v0 }
  0x18   :  { %183 = vmatpush3.bf16.msra.mxu0 %v182_v19 }
  0x19   :  { %184 = vmatprep.subr.bf16.mxu0 %v193_v0 }
  0x1c   :  { %186 = vmatpush3.bf16.msra.mxu0 %v185_v22 }
  0x1d   :  { %187 = vmatprep.subr.bf16.mxu0 %v193_v0 }
  0x20   :  { %189 = vmatpush3.bf16.msra.mxu0 %v188_v25 }
  0x23   :  { %164 = vmatmul.mubr.f32.vlgmr.msra.gmra.mrb[0].mxu0 %v14_v26 }
  0xf6   :  { %v104_v28 = vpop.f32.mrb[0].mxu0 }
  0xf7   :  { %v105_v29 = vadd.f32 %v113_v27, %v104_v28  ;;  %v165_v30 = vpop.f32.mrb[1].mxu0 }
  0xf9   :  { %108 = vst [vmem:[%s276_s3] sm:$0xff] %v105_v29 }

</bundles_post_ra>
